<compile_context>
chip_gen: v7x
topology: tpu7x:2x2x1
jax: 0.10.0
libtpu: 0.0.40
codegen_flags: <defaults>
</compile_context>

<pallas_src>
import jax
import jax.numpy as jnp
from jax.experimental import pallas as pl
from jax.experimental.pallas import tpu as pltpu

MAX_LOGSTD = 2.0
MIN_LOGSTD = -7.0
_LEAKY_SLOPE = 0.01  # PyTorch nn.LeakyReLU default negative_slope


def _round_up(x, m):
    return ((x + m - 1) // m) * m


def _encoder_kernel(x_ref, w1_ref, b1_ref, w2_ref, b2_ref, w3_ref, b3_ref,
                    out_ref):
    """One row-tile of the fused 3-layer MLP head."""
    x = x_ref[...]
    h = jnp.dot(x, w1_ref[...], preferred_element_type=jnp.float32) + b1_ref[...]
    h = jnp.where(h > 0, h, _LEAKY_SLOPE * h)                    # LeakyReLU (VPU)
    h = jnp.dot(h, w2_ref[...], preferred_element_type=jnp.float32) + b2_ref[...]
    h = jnp.tanh(h)                                              # Tanh (EUP)
    out = jnp.dot(h, w3_ref[...], preferred_element_type=jnp.float32) + b3_ref[...]
    out_ref[...] = out.astype(out_ref.dtype)


def _mlp_head_pallas(x, w1, b1, w2, b2, w3, b3, *, tile_n=512):
    """x: (N, in_dim) -> (N, out_dim) through the fused MLP kernel."""
    n, in_dim = x.shape
    h1 = w1.shape[1]
    h2 = w2.shape[1]
    out_dim = w3.shape[1]

    # Row tiling: pad N so the grid divides evenly; tiles are >= 8 rows.
    if n <= tile_n:
        tn = max(8, _round_up(n, 8))
        n_pad = tn
    else:
        tn = tile_n
        n_pad = _round_up(n, tn)
    if n_pad != n:
        x = jnp.pad(x, ((0, n_pad - n), (0, 0)))

    out = pl.pallas_call(
        _encoder_kernel,
        out_shape=jax.ShapeDtypeStruct((n_pad, out_dim), x.dtype),
        grid_spec=pltpu.PrefetchScalarGridSpec(
            num_scalar_prefetch=0,
            grid=(n_pad // tn,),
            in_specs=[
                pl.BlockSpec((tn, in_dim), lambda i: (i, 0)),     # row tile of x
                pl.BlockSpec((in_dim, h1), lambda i: (0, 0)),     # W1 resident
                pl.BlockSpec((1, h1), lambda i: (0, 0)),          # b1 resident
                pl.BlockSpec((h1, h2), lambda i: (0, 0)),         # W2 resident
                pl.BlockSpec((1, h2), lambda i: (0, 0)),          # b2 resident
                pl.BlockSpec((h2, out_dim), lambda i: (0, 0)),    # W3 resident
                pl.BlockSpec((1, out_dim), lambda i: (0, 0)),     # b3 resident
            ],
            out_specs=pl.BlockSpec((tn, out_dim), lambda i: (i, 0)),
        ),
        compiler_params=pltpu.CompilerParams(
            dimension_semantics=("parallel",),  # split row tiles across TCs (v7x)
        ),
    )(x, w1, b1.reshape(1, h1), w2, b2.reshape(1, h2), w3,
      b3.reshape(1, out_dim))
    return out[:n]


def base_encoder_forward(params, obs, act, obs2, deterministic=False, *,
                         module_deterministic=True, rng=None, tile_n=512):
    """JAX/Pallas equivalent of Base_Encoder.forward."""
    single = obs.ndim == 1
    if single:
        obs, act, obs2 = obs[None], act[None], obs2[None]

    lead = obs.shape[:-1]
    n = 1
    for s in lead:
        n *= int(s)

    delta_obs = obs2 - obs
    x = jnp.concatenate([obs, delta_obs, act], axis=-1)
    x = x.reshape(n, x.shape[-1])

    raw = _mlp_head_pallas(
        x, params["w1"], params["b1"], params["w2"], params["b2"],
        params["w3"], params["b3"], tile_n=tile_n)
    raw = raw.reshape(lead + (raw.shape[-1],))

    if module_deterministic:
        out = raw
    else:
        emb_dim = raw.shape[-1] // 2
        mean = raw[..., :emb_dim]
        logstd = jnp.clip(raw[..., emb_dim:], MIN_LOGSTD, MAX_LOGSTD)
        if deterministic:
            out = mean
        else:
            # rsample: mean + std * eps  (reparameterized, done in the wrapper)
            if rng is None:
                rng = jax.random.PRNGKey(0)
            out = mean + jnp.exp(logstd) * jax.random.normal(
                rng, mean.shape, dtype=mean.dtype)

    return out[0] if single else out


def init_params(key, obs_dim, act_dim, emb_dim, hidden_size=(256, 256),
                deterministic=True, scale=0.1):
    in_dim = 2 * obs_dim + act_dim
    out_dim = emb_dim if deterministic else 2 * emb_dim
    h1, h2 = hidden_size
    k1, k2, k3, k4, k5, k6 = jax.random.split(key, 6)
    return {
        "w1": scale * jax.random.normal(k1, (in_dim, h1), jnp.float32),
        "b1": scale * jax.random.normal(k2, (h1,), jnp.float32),
        "w2": scale * jax.random.normal(k3, (h1, h2), jnp.float32),
        "b2": scale * jax.random.normal(k4, (h2,), jnp.float32),
        "w3": scale * jax.random.normal(k5, (h2, out_dim), jnp.float32),
        "b3": scale * jax.random.normal(k6, (out_dim,), jnp.float32),
    }


def base_encoder_reference(params, obs, act, obs2):
    """Pure-JAX reference of _default_forward (raw head output)."""
    delta_obs = obs2 - obs
    x = jnp.concatenate([obs, delta_obs, act], axis=-1)
    h = x @ params["w1"] + params["b1"]
    h = jnp.where(h > 0, h, _LEAKY_SLOPE * h)
    h = jnp.tanh(h @ params["w2"] + params["b2"])
    return h @ params["w3"] + params["b3"]


if __name__ == "__main__":
    key = jax.random.PRNGKey(0)
    obs_dim, act_dim, emb_dim = 16, 4, 32
    hidden = (256, 256)
    batch, seq = 2, 8

    k_par, k_par_nd, k_obs, k_act, k_obs2 = jax.random.split(key, 5)
    params = init_params(k_par, obs_dim, act_dim, emb_dim, hidden,
                         deterministic=True)

    obs = jax.random.normal(k_obs, (batch, seq, obs_dim), dtype=jnp.float32)
    act = jax.random.normal(k_act, (batch, seq, act_dim), dtype=jnp.float32)
    obs2 = jax.random.normal(k_obs2, (batch, seq, obs_dim), dtype=jnp.float32)

    # Deterministic head: forward returns the mean.
    out = base_encoder_forward(params, obs, act, obs2, deterministic=True)
    out = jax.block_until_ready(out)
    ref = base_encoder_reference(params, obs, act, obs2)
    assert out.shape == (batch, seq, emb_dim), out.shape
    assert jnp.allclose(out, ref, rtol=1e-2, atol=1e-2), \
        "mismatch vs pure-JAX reference (deterministic head)"

    # 1-D (single transition) path.
    out_1d = base_encoder_forward(params, obs[0, 0], act[0, 0], obs2[0, 0],
                                  deterministic=True)
    out_1d = jax.block_until_ready(out_1d)
    assert out_1d.shape == (emb_dim,), out_1d.shape
    assert jnp.allclose(out_1d, ref[0, 0], rtol=1e-2, atol=1e-2)

    # Stochastic head, deterministic call -> returns the mean chunk.
    params_nd = init_params(k_par_nd, obs_dim, act_dim, emb_dim, hidden,
                            deterministic=False)
    out_nd = base_encoder_forward(params_nd, obs, act, obs2,
                                  deterministic=True,
                                  module_deterministic=False)
    out_nd = jax.block_until_ready(out_nd)
    ref_nd = base_encoder_reference(params_nd, obs, act, obs2)[..., :emb_dim]
    assert out_nd.shape == (batch, seq, emb_dim), out_nd.shape
    assert jnp.allclose(out_nd, ref_nd, rtol=1e-2, atol=1e-2), \
        "mismatch vs pure-JAX reference (stochastic head mean)"

    print("KERNEL_OK")
</pallas_src>

<mosaic_0001>
module attributes {stable_mosaic.version = 11 : i64} {
  func.func @_encoder_kernel(%arg0: i32, %arg1: memref<16x36xf32, #tpu.memory_space<vmem>>, %arg2: memref<36x256xf32, #tpu.memory_space<vmem>>, %arg3: memref<1x256xf32, #tpu.memory_space<vmem>>, %arg4: memref<256x256xf32, #tpu.memory_space<vmem>>, %arg5: memref<1x256xf32, #tpu.memory_space<vmem>>, %arg6: memref<256x32xf32, #tpu.memory_space<vmem>>, %arg7: memref<1x32xf32, #tpu.memory_space<vmem>>, %arg8: memref<16x32xf32, #tpu.memory_space<vmem>>) attributes {dimension_semantics = [#tpu.dimension_semantics<parallel>], iteration_bounds = array<i64: 1>, scalar_prefetch = 0 : i64, scratch_operands = 0 : i64, tpu.core_type = #tpu.core_type<tc>, window_params = [{transform_indices = @transform_0, window_bounds = array<i64: 16, 36>}, {pipeline_mode = #tpu.pipeline_mode<synchronous>, transform_indices = @transform_1, window_bounds = array<i64: 36, 256>}, {pipeline_mode = #tpu.pipeline_mode<synchronous>, transform_indices = @transform_2, window_bounds = array<i64: 1, 256>}, {pipeline_mode = #tpu.pipeline_mode<synchronous>, transform_indices = @transform_3, window_bounds = array<i64: 256, 256>}, {pipeline_mode = #tpu.pipeline_mode<synchronous>, transform_indices = @transform_4, window_bounds = array<i64: 1, 256>}, {pipeline_mode = #tpu.pipeline_mode<synchronous>, transform_indices = @transform_5, window_bounds = array<i64: 256, 32>}, {pipeline_mode = #tpu.pipeline_mode<synchronous>, transform_indices = @transform_6, window_bounds = array<i64: 1, 32>}, {transform_indices = @transform_7, window_bounds = array<i64: 16, 32>}]} {
    %c0 = arith.constant 0 : index
    %c0_0 = arith.constant 0 : index
    %0 = vector.load %arg1[%c0, %c0_0] : memref<16x36xf32, #tpu.memory_space<vmem>>, vector<16x36xf32>
    %c0_1 = arith.constant 0 : index
    %c0_2 = arith.constant 0 : index
    %1 = vector.load %arg2[%c0_1, %c0_2] : memref<36x256xf32, #tpu.memory_space<vmem>>, vector<36x256xf32>
    %cst = arith.constant dense<0.000000e+00> : vector<16x256xf32>
    %2 = tpu.matmul %0, %1, %cst {dimension_numbers = #tpu.dot_dimension_numbers<[1], [0], [0], [1], [0, 0, 1, 1], [], []>} : vector<16x36xf32>, vector<36x256xf32>, vector<16x256xf32> -> vector<16x256xf32>
    %c0_3 = arith.constant 0 : index
    %c0_4 = arith.constant 0 : index
    %3 = vector.load %arg3[%c0_3, %c0_4] : memref<1x256xf32, #tpu.memory_space<vmem>>, vector<1x256xf32>
    %4 = vector.broadcast %3 : vector<1x256xf32> to vector<16x256xf32>
    %5 = arith.addf %2, %4 : vector<16x256xf32>
    %cst_5 = arith.constant 0.000000e+00 : f32
    %6 = vector.broadcast %cst_5 : f32 to vector<16x256xf32>
    %7 = arith.cmpf ogt, %5, %6 : vector<16x256xf32>
    %cst_6 = arith.constant 0.00999999977 : f32
    %8 = vector.broadcast %cst_6 : f32 to vector<16x256xf32>
    %9 = arith.mulf %8, %5 : vector<16x256xf32>
    %10 = arith.select %7, %5, %9 : vector<16x256xi1>, vector<16x256xf32>
    %c0_7 = arith.constant 0 : index
    %c0_8 = arith.constant 0 : index
    %11 = vector.load %arg4[%c0_7, %c0_8] : memref<256x256xf32, #tpu.memory_space<vmem>>, vector<256x256xf32>
    %cst_9 = arith.constant dense<0.000000e+00> : vector<16x256xf32>
    %12 = tpu.matmul %10, %11, %cst_9 {dimension_numbers = #tpu.dot_dimension_numbers<[1], [0], [0], [1], [0, 0, 1, 1], [], []>} : vector<16x256xf32>, vector<256x256xf32>, vector<16x256xf32> -> vector<16x256xf32>
    %c0_10 = arith.constant 0 : index
    %c0_11 = arith.constant 0 : index
    %13 = vector.load %arg5[%c0_10, %c0_11] : memref<1x256xf32, #tpu.memory_space<vmem>>, vector<1x256xf32>
    %14 = vector.broadcast %13 : vector<1x256xf32> to vector<16x256xf32>
    %15 = arith.addf %12, %14 : vector<16x256xf32>
    %16 = math.tanh %15 : vector<16x256xf32>
    %c0_12 = arith.constant 0 : index
    %c0_13 = arith.constant 0 : index
    %17 = vector.load %arg6[%c0_12, %c0_13] : memref<256x32xf32, #tpu.memory_space<vmem>>, vector<256x32xf32>
    %cst_14 = arith.constant dense<0.000000e+00> : vector<16x32xf32>
    %18 = tpu.matmul %16, %17, %cst_14 {dimension_numbers = #tpu.dot_dimension_numbers<[1], [0], [0], [1], [0, 0, 1, 1], [], []>} : vector<16x256xf32>, vector<256x32xf32>, vector<16x32xf32> -> vector<16x32xf32>
    %c0_15 = arith.constant 0 : index
    %c0_16 = arith.constant 0 : index
    %19 = vector.load %arg7[%c0_15, %c0_16] : memref<1x32xf32, #tpu.memory_space<vmem>>, vector<1x32xf32>
    %20 = vector.broadcast %19 : vector<1x32xf32> to vector<16x32xf32>
    %21 = arith.addf %18, %20 : vector<16x32xf32>
    %c0_17 = arith.constant 0 : index
    %c0_18 = arith.constant 0 : index
    %22 = vector.load %arg8[%c0_17, %c0_18] : memref<16x32xf32, #tpu.memory_space<vmem>>, vector<16x32xf32>
    tpu.vector_store %arg8[%c0_17, %c0_18], %21 {strides = array<i32>} : memref<16x32xf32, #tpu.memory_space<vmem>>, vector<16x32xf32>,
    return
  }
  func.func @transform_0(%arg0: i32) -> (i32, i32) {
    %c0_i32 = arith.constant 0 : i32
    %c0_i32_0 = arith.constant 0 : i32
    return %arg0, %c0_i32 : i32, i32
  }
  func.func @transform_1(%arg0: i32) -> (i32, i32) {
    %c0_i32 = arith.constant 0 : i32
    %c0_i32_0 = arith.constant 0 : i32
    %c0_i32_1 = arith.constant 0 : i32
    return %c0_i32, %c0_i32_0 : i32, i32
  }
  func.func @transform_2(%arg0: i32) -> (i32, i32) {
    %c0_i32 = arith.constant 0 : i32
    %c0_i32_0 = arith.constant 0 : i32
    %c0_i32_1 = arith.constant 0 : i32
    return %c0_i32, %c0_i32_0 : i32, i32
  }
  func.func @transform_3(%arg0: i32) -> (i32, i32) {
    %c0_i32 = arith.constant 0 : i32
    %c0_i32_0 = arith.constant 0 : i32
    %c0_i32_1 = arith.constant 0 : i32
    return %c0_i32, %c0_i32_0 : i32, i32
  }
  func.func @transform_4(%arg0: i32) -> (i32, i32) {
    %c0_i32 = arith.constant 0 : i32
    %c0_i32_0 = arith.constant 0 : i32
    %c0_i32_1 = arith.constant 0 : i32
    return %c0_i32, %c0_i32_0 : i32, i32
  }
  func.func @transform_5(%arg0: i32) -> (i32, i32) {
    %c0_i32 = arith.constant 0 : i32
    %c0_i32_0 = arith.constant 0 : i32
    %c0_i32_1 = arith.constant 0 : i32
    return %c0_i32, %c0_i32_0 : i32, i32
  }
  func.func @transform_6(%arg0: i32) -> (i32, i32) {
    %c0_i32 = arith.constant 0 : i32
    %c0_i32_0 = arith.constant 0 : i32
    %c0_i32_1 = arith.constant 0 : i32
    return %c0_i32, %c0_i32_0 : i32, i32
  }
  func.func @transform_7(%arg0: i32) -> (i32, i32) {
    %c0_i32 = arith.constant 0 : i32
    %c0_i32_0 = arith.constant 0 : i32
    return %arg0, %c0_i32 : i32, i32
  }
}

</mosaic_0001>

<bundles_post_ra>
// kernel: tpu_custom_call.1
= control target key start
LH: loop header
LB: loop body
LE: loop exit
PB: predicated region body
PF: predicated region fallthrough
CT: control target
= control target key end

     0   :  { %12 = vsyncpa [#allocation3], 0  ;;  %s889_s0 = inlined_call_operand.vmem [shape: f32[16,36], index: 0, kind: input, shape index: {}]   ;;  %s890_s1 = inlined_call_operand.vmem [shape: f32[36,256], index: 1, kind: input, shape index: {}]   ;;  %s891_s2 = inlined_call_operand.vmem [shape: f32[1,256], index: 2, kind: input, shape index: {}]   ;;  %s892_s3 = inlined_call_operand.hbm [shape: f32[256,256], index: 3, kind: input, shape index: {}]   ;;  %s893_s4 = inlined_call_operand.vmem [shape: f32[1,256], index: 4, kind: input, shape index: {}]   ;;  %s894_s5 = inlined_call_operand.vmem [shape: f32[256,32], index: 5, kind: input, shape index: {}]   ;;  %s895_s6 = inlined_call_operand.vmem [shape: f32[1,32], index: 6, kind: input, shape index: {}]   ;;  %s896_s7 = inlined_call_operand.hbm [shape: f32[16,32], index: 7, kind: output, shape index: {}]  }
   0x1   :  { %13 = vsyncpa [#allocation4], 0  ;;  %s669_s24 = smov [#allocation2]   ;;  %s621_s28 = scalar_lea.hbm %s892_s3, 8192 }
   0x2   :  { %s25_s25 = sshll.u32 %s669_s24, 4  ;;  %p622_p0 = scmp.ne.s32.totalorder %s892_s3, %s621_s28  ;;  %s26_s25 = int_to_ptr.vmem [resolvable:$true] %s25_s25 }
   0x3   :  { %p625_p1 = scmp.lt.u32.totalorder %s621_s28, %s892_s3 }
   0x5   :  { %p627_p2 = pnand %p625_p1, %p622_p0 }
   0x7   :  { %630 = shalt.err (!%p627_p2)
}
   0x8   :  { %s631_s10 = scalar_lea.vmem %s26_s25, 8192  ;;  %p636_p4 = scmp.lt.s32.totalorder %s26_s25, %s26_s25 }
   0x9   :  { %p632_p3 = scmp.ne.s32.totalorder %s26_s25, %s631_s10  ;;  %p637_p5 = scmp.lt.s32.totalorder %s631_s10, %s631_s10 }
   0xb   :  { %p638_p6 = por %p637_p5, %p636_p4 }
   0xd   :  { %p639_p7 = pnand %p638_p6, %p632_p3 }
   0xf   :  { %642 = shalt.err (!%p639_p7)
}
  0x10   :  { %s670_s11 = smov 256   ;;  %s671_s12 = smov 16  }
  0x11   :  { %31 = dma.hbm_to_vmem [thread:$0]  %s892_s3, 8192, %s26_s25, [#allocation3], %s670_s11, %s670_s11, %s671_s12  }
  0x12   :  { %665 = dma.done.wait [#allocation3], 8192  }
  0x13   :  { %666 = vsyncadd [#allocation3], 4294959104  ;;  %v672_v0 = vmov 0.0   ;;  %v44_v1 = vld [vmem:[%s890_s1 + $0x8] sm:$0xff]  ;;  %v46_v2 = vld [vmem:[%s890_s1 + $0x18] sm:$0xff]  ;;  %vm72_vm0 = vcmask 1043456  }
  0x14   :  { %143 = vmatprep.mubr.f32.mxu0 %v672_v0  ;;  %v43_v3 = vld [vmem:[%s890_s1] sm:$0xff]  ;;  %v502_v4 = vpack.c.bf16 %v46_v2, %v44_v1  ;;  %v45_v5 = vld [vmem:[%s890_s1 + $0x10] sm:$0xff]  ;;  %v48_v6 = vld [vmem:[%s890_s1 + $0x28] sm:$0xff]  ;;  %vm65_vm1 = vcmask 293888   ;;  %vm439_vm6 = vcmask 261120   ;;  %s673_s26 = smov [#allocation5]  }
  0x15   :  { %v50_v7 = vld [vmem:[%s890_s1 + $0x38] sm:$0xff]  ;;  %v504_v8 = vpack.c.bf16 %v45_v5, %v43_v3  ;;  %v47_v10 = vld [vmem:[%s890_s1 + $0x20] sm:$0xff]  ;;  %v49_v11 = vld [vmem:[%s890_s1 + $0x30] sm:$0xff]  ;;  %s447_s27 = sshll.u32 %s673_s26, 4  ;;  %s448_s27 = int_to_ptr.vmem [resolvable:$true] %s447_s27 }
  0x16   :  { %v506_v9 = vpack.c.bf16 %v50_v7, %v48_v6  ;;  %503 = vmatprep.subr.bf16.mxu0 %v502_v4  ;;  %v508_v12 = vpack.c.bf16 %v49_v11, %v47_v10  ;;  %v52_v13 = vld [vmem:[%s890_s1 + $0x48] sm:$0xf]  ;;  %v171_v15 = vld [vmem:[#allocation2 + $0x18] sm:$0xff]  ;;  %v168_v16 = vld [vmem:[#allocation2] sm:$0xff]  ;;  %s643_s28 = scalar_lea.vmem %s448_s27, 256  ;;  %p648_p9 = scmp.lt.s32.totalorder %s448_s27, %s448_s27 }
  0x17   :  { %505 = vmatpush1.bf16.msra.mxu0 %v504_v8  ;;  %v169_v14 = vld [vmem:[#allocation2 + $0x8] sm:$0xff]  ;;  %v170_v18 = vld [vmem:[#allocation2 + $0x10] sm:$0xff]  ;;  %v175_v20 = vld [vmem:[#allocation2 + $0x38] sm:$0xff]  ;;  %p644_p8 = scmp.ne.s32.totalorder %s448_s27, %s643_s28  ;;  %p649_p10 = scmp.lt.s32.totalorder %s643_s28, %s643_s28 }
  0x18   :  { %507 = vmatprep.subr.bf16.mxu0 %v506_v9  ;;  %v510_v17 = vpack.c.bf16 %v171_v15, %v169_v14  ;;  %v173_v19 = vld [vmem:[#allocation2 + $0x28] sm:$0xff]  ;;  %v512_v21 = vpack.c.bf16 %v170_v18, %v168_v16  ;;  %v172_v23 = vld [vmem:[#allocation2 + $0x20] sm:$0xff]  ;;  %v174_v24 = vld [vmem:[#allocation2 + $0x30] sm:$0xff] }
  0x19   :  { %v514_v22 = vpack.c.bf16 %v175_v20, %v173_v19  ;;  %v177_v25 = vld [vmem:[#allocation2 + $0x48] sm:$0xff]  ;;  %v179_v26 = vld [vmem:[#allocation2 + $0x58] sm:$0xff]  ;;  %v516_v27 = vpack.c.bf16 %v174_v24, %v172_v23  ;;  %v51_v28 = vld [vmem:[%s890_s1 + $0x40] sm:$0xf]  ;;  %p650_p11 = por %p649_p10, %p648_p9 }
  0x1a   :  { %511 = vmatprep.subr.bf16.mxu1 %v510_v17  ;;  %v518_v29 = vpack.c.bf16 %v179_v26, %v177_v25  ;;  %v176_v30 = vld [vmem:[#allocation2 + $0x40] sm:$0xff]  ;;  %v178_v31 = vld [vmem:[#allocation2 + $0x50] sm:$0xff]  ;;  %v181_v33 = vld [vmem:[#allocation2 + $0x68] sm:$0xff] }
  0x1b   :  { %509 = vmatpush1.bf16.msra.mxu0 %v508_v12  ;;  %513 = vmatpush1.bf16.msra.mxu1 %v512_v21  ;;  %v41_v32 = vld [vmem:[%s889_s0] sm:$0xff]  ;;  %v183_v34 = vld [vmem:[#allocation2 + $0x78] sm:$0xff]  ;;  %v520_v35 = vpack.c.bf16 %v178_v31, %v176_v30  ;;  %v182_v38 = vld [vmem:[#allocation2 + $0x70] sm:$0xff]  ;;  %p651_p12 = pnand %p650_p11, %p644_p8 }
  0x1c   :  { %459 = vmatprep.subr.msk.mxu0 %vm72_vm0, %v52_v13  ;;  %515 = vmatprep.subr.bf16.mxu1 %v514_v22  ;;  %v522_v36 = vpack.c.bf16 %v183_v34, %v181_v33  ;;  %v180_v37 = vld [vmem:[#allocation2 + $0x60] sm:$0xff]  ;;  %v42_v39 = vld [vmem:[%s889_s0 + $0x8] sm:$0xff]  ;;  %v187_v41 = vld [vmem:[#allocation2 + $0x98] sm:$0xff] }
  0x1d   :  { %v185_v40 = vld [vmem:[#allocation2 + $0x88] sm:$0xff]  ;;  %v524_v42 = vpack.c.bf16 %v182_v38, %v180_v37  ;;  %v184_v44 = vld [vmem:[#allocation2 + $0x80] sm:$0xff]  ;;  %v186_v45 = vld [vmem:[#allocation2 + $0x90] sm:$0xff] }
  0x1e   :  { %v526_v43 = vpack.c.bf16 %v187_v41, %v185_v40  ;;  %v189_v46 = vld [vmem:[#allocation2 + $0xa8] sm:$0xff]  ;;  %v191_v47 = vld [vmem:[#allocation2 + $0xb8] sm:$0xff]  ;;  %v528_v48 = vpack.c.bf16 %v186_v45, %v184_v44  ;;  %v188_v50 = vld [vmem:[#allocation2 + $0xa0] sm:$0xff] }
  0x1f   :  { %460 = vmatpush1.msk.msra.mxu0 %vm72_vm0, %v51_v28  ;;  %517 = vmatpush1.bf16.msra.mxu1 %v516_v27  ;;  %v530_v49 = vpack.c.bf16 %v191_v47, %v189_v46  ;;  %v190_v51 = vld [vmem:[#allocation2 + $0xb0] sm:$0xff]  ;;  %v193_v52 = vld [vmem:[#allocation2 + $0xc8] sm:$0xff]  ;;  %v195_v53 = vld [vmem:[#allocation2 + $0xd8] sm:$0xff] }
  0x20   :  { %461 = vmatmul.mubr.msk.f32.vlgmr.msra.gmra.mrb[0].mxu0 %vm65_vm1, %v41_v32  ;;  %519 = vmatprep.subr.bf16.mxu1 %v518_v29  ;;  %v532_v54 = vpack.c.bf16 %v190_v51, %v188_v50  ;;  %v534_v55 = vpack.c.bf16 %v195_v53, %v193_v52  ;;  %v192_v56 = vld [vmem:[#allocation2 + $0xc0] sm:$0xff]  ;;  %v194_v57 = vld [vmem:[#allocation2 + $0xd0] sm:$0xff]  ;;  %v197_v58 = vld [vmem:[#allocation2 + $0xe8] sm:$0xff] }
  0x21   :  { %149 = vmatprep.mubr.f32.mxu0 %v672_v0  ;;  %v199_v59 = vld [vmem:[#allocation2 + $0xf8] sm:$0xff]  ;;  %v536_v60 = vpack.c.bf16 %v194_v57, %v192_v56  ;;  %v196_v62 = vld [vmem:[#allocation2 + $0xe0] sm:$0xff]  ;;  %v198_v63 = vld [vmem:[#allocation2 + $0xf0] sm:$0xff] }
  0x22   :  { %v538_v61 = vpack.c.bf16 %v199_v59, %v197_v58  ;;  %v201_v0 = vld [vmem:[#allocation2 + $0x108] sm:$0xff]  ;;  %v203_v1 = vld [vmem:[#allocation2 + $0x118] sm:$0xff]  ;;  %v540_v2 = vpack.c.bf16 %v198_v63, %v196_v62  ;;  %v200_v4 = vld [vmem:[#allocation2 + $0x100] sm:$0xff] }
  0x23   :  { %521 = vmatpush1.bf16.msra.mxu1 %v520_v35  ;;  %v542_v3 = vpack.c.bf16 %v203_v1, %v201_v0  ;;  %v202_v5 = vld [vmem:[#allocation2 + $0x110] sm:$0xff]  ;;  %v205_v6 = vld [vmem:[#allocation2 + $0x128] sm:$0xff]  ;;  %v207_v7 = vld [vmem:[#allocation2 + $0x138] sm:$0xff] }
  0x24   :  { %462 = vmatmul.mubr.msk.f32.gmra.mrb[2].mxu0 %vm65_vm1, %v42_v39  ;;  %523 = vmatprep.subr.bf16.mxu1 %v522_v36  ;;  %v544_v8 = vpack.c.bf16 %v202_v5, %v200_v4  ;;  %v546_v9 = vpack.c.bf16 %v207_v7, %v205_v6  ;;  %v204_v10 = vld [vmem:[#allocation2 + $0x120] sm:$0xff]  ;;  %v206_v11 = vld [vmem:[#allocation2 + $0x130] sm:$0xff]  ;;  %v209_v12 = vld [vmem:[#allocation2 + $0x148] sm:$0xff] }
  0x25   :  { %v211_v13 = vld [vmem:[#allocation2 + $0x158] sm:$0xff]  ;;  %v548_v14 = vpack.c.bf16 %v206_v11, %v204_v10  ;;  %v208_v16 = vld [vmem:[#allocation2 + $0x140] sm:$0xff]  ;;  %v210_v17 = vld [vmem:[#allocation2 + $0x150] sm:$0xff] }
  0x26   :  { %v550_v15 = vpack.c.bf16 %v211_v13, %v209_v12  ;;  %v213_v18 = vld [vmem:[#allocation2 + $0x168] sm:$0xff]  ;;  %v215_v19 = vld [vmem:[#allocation2 + $0x178] sm:$0xff]  ;;  %v552_v20 = vpack.c.bf16 %v210_v17, %v208_v16  ;;  %v212_v22 = vld [vmem:[#allocation2 + $0x160] sm:$0xff] }
  0x27   :  { %525 = vmatpush1.bf16.msra.mxu1 %v524_v42  ;;  %v554_v21 = vpack.c.bf16 %v215_v19, %v213_v18  ;;  %v214_v23 = vld [vmem:[#allocation2 + $0x170] sm:$0xff]  ;;  %v217_v24 = vld [vmem:[#allocation2 + $0x188] sm:$0xff]  ;;  %v219_v25 = vld [vmem:[#allocation2 + $0x198] sm:$0xff] }
  0x28   :  { %527 = vmatprep.subr.bf16.mxu1 %v526_v43  ;;  %v556_v26 = vpack.c.bf16 %v214_v23, %v212_v22  ;;  %v558_v27 = vpack.c.bf16 %v219_v25, %v217_v24  ;;  %v216_v28 = vld [vmem:[#allocation2 + $0x180] sm:$0xff]  ;;  %v218_v29 = vld [vmem:[#allocation2 + $0x190] sm:$0xff]  ;;  %v221_v30 = vld [vmem:[#allocation2 + $0x1a8] sm:$0xff] }
  0x29   :  { %v223_v31 = vld [vmem:[#allocation2 + $0x1b8] sm:$0xff]  ;;  %v560_v32 = vpack.c.bf16 %v218_v29, %v216_v28  ;;  %v220_v34 = vld [vmem:[#allocation2 + $0x1a0] sm:$0xff]  ;;  %v222_v35 = vld [vmem:[#allocation2 + $0x1b0] sm:$0xff] }
  0x2a   :  { %v562_v33 = vpack.c.bf16 %v223_v31, %v221_v30  ;;  %v564_v36 = vpack.c.bf16 %v222_v35, %v220_v34  ;;  %v225_v37 = vld [vmem:[#allocation2 + $0x1c8] sm:$0xff]  ;;  %v227_v38 = vld [vmem:[#allocation2 + $0x1d8] sm:$0xff]  ;;  %v224_v40 = vld [vmem:[#allocation2 + $0x1c0] sm:$0xff] }
  0x2b   :  { %529 = vmatpush1.bf16.msra.mxu1 %v528_v48  ;;  %v566_v39 = vpack.c.bf16 %v227_v38, %v225_v37  ;;  %v226_v41 = vld [vmem:[#allocation2 + $0x1d0] sm:$0xff]  ;;  %v229_v43 = vld [vmem:[#allocation2 + $0x1e8] sm:$0xff]  ;;  %v231_v44 = vld [vmem:[#allocation2 + $0x1f8] sm:$0xff] }
  0x2c   :  { %531 = vmatprep.subr.bf16.mxu1 %v530_v49  ;;  %v568_v42 = vpack.c.bf16 %v226_v41, %v224_v40  ;;  %v570_v45 = vpack.c.bf16 %v231_v44, %v229_v43  ;;  %v228_v46 = vld [vmem:[#allocation2 + $0x1e0] sm:$0xff]  ;;  %v230_v47 = vld [vmem:[#allocation2 + $0x1f0] sm:$0xff]  ;;  %v342_v50 = vld [vmem:[%s894_s5 + $0x88] sm:$0xff] }
  0x2d   :  { %v572_v48 = vpack.c.bf16 %v230_v47, %v228_v46  ;;  %v341_v49 = vld [vmem:[%s894_s5 + $0x80] sm:$0xff]  ;;  %v326_v53 = vld [vmem:[%s894_s5 + $0x8] sm:$0xff]  ;;  %v327_v58 = vld [vmem:[%s894_s5 + $0x10] sm:$0xff] }
  0x2e   :  { %v325_v51 = vld [vmem:[%s894_s5] sm:$0xff]  ;;  %v574_v52 = vpack.c.bf16 %v342_v50, %v341_v49  ;;  %v328_v59 = vld [vmem:[%s894_s5 + $0x18] sm:$0xff]  ;;  %v330_v1 = vld [vmem:[%s894_s5 + $0x28] sm:$0xff] }
  0x2f   :  { %533 = vmatpush1.bf16.msra.mxu1 %v532_v54  ;;  %v343_v54 = vld [vmem:[%s894_s5 + $0x90] sm:$0xff]  ;;  %v576_v56 = vpack.c.bf16 %v326_v53, %v325_v51  ;;  %v580_v62 = vpack.c.bf16 %v328_v59, %v327_v58  ;;  %v329_v0 = vld [vmem:[%s894_s5 + $0x20] sm:$0xff]  ;;  %v332_v7 = vld [vmem:[%s894_s5 + $0x38] sm:$0xff] }
  0x30   :  { %535 = vmatprep.subr.bf16.mxu1 %v534_v55  ;;  %v344_v55 = vld [vmem:[%s894_s5 + $0x98] sm:$0xff]  ;;  %575 = vmatprep.subr.bf16.mxu0 %v574_v52  ;;  %v584_v4 = vpack.c.bf16 %v330_v1, %v329_v0  ;;  %v331_v6 = vld [vmem:[%s894_s5 + $0x30] sm:$0xff]  ;;  %v53_v12 = vld [vmem:[%s891_s2] sm:$0x3] }
  0x31   :  { %v578_v57 = vpack.c.bf16 %v344_v55, %v343_v54  ;;  %577 = vmatpush3.bf16.msra.mxu0 %v576_v56  ;;  %v333_v35 = vld [vmem:[%s894_s5 + $0x40] sm:$0xff]  ;;  %v351_v38 = vld [vmem:[%s894_s5 + $0xd0] sm:$0xff]  ;;  %v356_v51 = vld [vmem:[%s894_s5 + $0xf8] sm:$0xff] }
  0x32   :  { %v335_v41 = vld [vmem:[%s894_s5 + $0x50] sm:$0xff]  ;;  %v353_v44 = vld [vmem:[%s894_s5 + $0xe0] sm:$0xff]  ;;  %v340_v54 = vld [vmem:[%s894_s5 + $0x78] sm:$0xff] }
  0x33   :  { %537 = vmatpush1.bf16.msra.mxu1 %v536_v60  ;;  %v345_v60 = vld [vmem:[%s894_s5 + $0xa0] sm:$0xff]  ;;  %579 = vmatprep.subr.bf16.mxu0 %v578_v57  ;;  %v355_v50 = vld [vmem:[%s894_s5 + $0xf0] sm:$0xff] }
  0x34   :  { %539 = vmatprep.subr.bf16.mxu1 %v538_v61  ;;  %v346_v61 = vld [vmem:[%s894_s5 + $0xa8] sm:$0xff]  ;;  %v337_v47 = vld [vmem:[%s894_s5 + $0x60] sm:$0xff]  ;;  %v339_v52 = vld [vmem:[%s894_s5 + $0x70] sm:$0xff]  ;;  %v602_v53 = vpack.c.bf16 %v356_v51, %v355_v50 }
  0x35   :  { %v582_v63 = vpack.c.bf16 %v346_v61, %v345_v60  ;;  %581 = vmatpush3.bf16.msra.mxu0 %v580_v62  ;;  %v604_v55 = vpack.c.bf16 %v340_v54, %v339_v52  ;;  %v232_v56 = vld [vmem:[%s893_s4] sm:$0x3] }
  0x37   :  { %541 = vmatpush1.bf16.msra.mxu1 %v540_v2  ;;  %v347_v2 = vld [vmem:[%s894_s5 + $0xb0] sm:$0xff]  ;;  %583 = vmatprep.subr.bf16.mxu0 %v582_v63 }
  0x38   :  { %543 = vmatprep.subr.bf16.mxu1 %v542_v3  ;;  %v348_v3 = vld [vmem:[%s894_s5 + $0xb8] sm:$0xff] }
  0x39   :  { %v586_v5 = vpack.c.bf16 %v348_v3, %v347_v2  ;;  %585 = vmatpush3.bf16.msra.mxu0 %v584_v4 }
  0x3b   :  { %545 = vmatpush1.bf16.msra.mxu1 %v544_v8  ;;  %v588_v8 = vpack.c.bf16 %v332_v7, %v331_v6  ;;  %587 = vmatprep.subr.bf16.mxu0 %v586_v5 }
  0x3c   :  { %547 = vmatprep.subr.bf16.mxu1 %v546_v9  ;;  %v55_v9 = vlaneseq }
  0x3d   :  { %589 = vmatpush3.bf16.msra.mxu0 %v588_v8  ;;  %v463_v8 = vld [vmem:[%s895_s6] ss:$0 sm:$0xff] }
  0x3e   :  { %v816_v10 = vshrl.u32 %v55_v9, 7 }
  0x3f   :  { %549 = vmatpush1.bf16.msra.mxu1 %v548_v14 }
  0x40   :  { %551 = vmatprep.subr.bf16.mxu1 %v550_v15  ;;  %v57_v11 = vsub.s32 0, %v816_v10  ;;  %v61_v13 = vsub.s32 1, %v816_v10 }
  0x42   :  { %v58_v14 = vrot.slane %v53_v12, %v57_v11  ;;  %v62_v15 = vrot.slane %v53_v12, %v61_v13  ;;  %v237_v57 = vrot.slane %v232_v56, %v57_v11  ;;  %v241_v58 = vrot.slane %v232_v56, %v61_v13 }
  0x43   :  { %553 = vmatpush1.bf16.msra.mxu1 %v552_v20 }
  0x44   :  { %555 = vmatprep.subr.bf16.mxu1 %v554_v21 }
  0x47   :  { %557 = vmatpush1.bf16.msra.mxu1 %v556_v26 }
  0x48   :  { %559 = vmatprep.subr.bf16.mxu1 %v558_v27 }
  0x4b   :  { %561 = vmatpush1.bf16.msra.mxu1 %v560_v32  ;;  %v349_v32 = vld [vmem:[%s894_s5 + $0xc0] sm:$0xff] }
  0x4c   :  { %563 = vmatprep.subr.bf16.mxu1 %v562_v33  ;;  %v350_v33 = vld [vmem:[%s894_s5 + $0xc8] sm:$0xff] }
  0x4d   :  { %v590_v34 = vpack.c.bf16 %v350_v33, %v349_v32 }
  0x4f   :  { %565 = vmatpush1.bf16.msra.mxu1 %v564_v36  ;;  %v334_v36 = vld [vmem:[%s894_s5 + $0x48] sm:$0xff]  ;;  %591 = vmatprep.subr.bf16.mxu0 %v590_v34 }
  0x50   :  { %567 = vmatprep.subr.bf16.mxu1 %v566_v39  ;;  %v592_v37 = vpack.c.bf16 %v334_v36, %v333_v35  ;;  %v352_v39 = vld [vmem:[%s894_s5 + $0xd8] sm:$0xff] }
  0x51   :  { %v594_v40 = vpack.c.bf16 %v352_v39, %v351_v38 }
  0x52   :  { %593 = vmatpush3.bf16.msra.mxu0 %v592_v37 }
  0x53   :  { %569 = vmatpush1.bf16.msra.mxu1 %v568_v42  ;;  %v336_v42 = vld [vmem:[%s894_s5 + $0x58] sm:$0xff]  ;;  %595 = vmatprep.subr.bf16.mxu0 %v594_v40 }
  0x54   :  { %571 = vmatprep.subr.bf16.mxu1 %v570_v45  ;;  %v596_v43 = vpack.c.bf16 %v336_v42, %v335_v41  ;;  %v354_v45 = vld [vmem:[%s894_s5 + $0xe8] sm:$0xff] }
  0x55   :  { %v598_v46 = vpack.c.bf16 %v354_v45, %v353_v44 }
  0x56   :  { %597 = vmatpush3.bf16.msra.mxu0 %v596_v43 }
  0x57   :  { %573 = vmatpush1.bf16.msra.mxu1 %v572_v48  ;;  %v338_v48 = vld [vmem:[%s894_s5 + $0x68] sm:$0xff]  ;;  %599 = vmatprep.subr.bf16.mxu0 %v598_v46 }
  0x58   :  { %v600_v49 = vpack.c.bf16 %v338_v48, %v337_v47 }
  0x5a   :  { %601 = vmatpush3.bf16.msra.mxu0 %v600_v49 }
  0x5b   :  { %603 = vmatprep.subr.bf16.mxu0 %v602_v53 }
  0x5e   :  { %605 = vmatpush3.bf16.msra.mxu0 %v604_v55 }
  0xf3   :  { %v145_v16 = vpop.f32.mrb[0].mxu0 }
  0xf4   :  { %v146_v17 = vadd.f32 %v145_v16, %v58_v14  ;;  %v147_v18 = vpop.f32.mrb[1].mxu0 }
  0xf5   :  { %v148_v19 = vadd.f32 %v147_v18, %v62_v15 }
  0xf6   :  { %v160_v20 = vmul.f32 0.01, %v146_v17  ;;  %vm156_vm3 = vcmp.gt.f32.partialorder %v146_v17, 0.0 }
  0xf7   :  { %v151_v21 = vpop.f32.mrb[2].mxu0  ;;  %vm157_vm2 = vcmp.gt.f32.partialorder %v148_v19, 0.0  ;;  %v161_v22 = vmul.f32 0.01, %v148_v19 }
  0xf8   :  { %v152_v23 = vadd.f32 %v151_v21, %v58_v14  ;;  %v153_v24 = vpop.f32.mrb[3].mxu0  ;;  %v164_v28 = vsel %vm156_vm3, %v146_v17, %v160_v20 }
  0xf9   :  { %v154_v25 = vadd.f32 %v153_v24, %v62_v15  ;;  %v165_v26 = vsel %vm157_vm2, %v148_v19, %v161_v22 }
  0xfa   :  { %v162_v27 = vmul.f32 0.01, %v152_v23  ;;  %308 = vmatprep.mubr.f32.mxu1 %v165_v26  ;;  %vm158_vm5 = vcmp.gt.f32.partialorder %v152_v23, 0.0 }
  0xfb   :  { %v163_v29 = vmul.f32 0.01, %v154_v25  ;;  %309 = vmatmul.mubr.f32.vlgmr.msra.gmra.mrb[0].mxu1 %v164_v28  ;;  %vm159_vm4 = vcmp.gt.f32.partialorder %v154_v25, 0.0 }
  0xfc   :  { %v166_v31 = vsel %vm158_vm5, %v152_v23, %v162_v27 }
  0xfd   :  { %v167_v30 = vsel %vm159_vm4, %v154_v25, %v163_v29 }
  0xfe   :  { %314 = vmatprep.mubr.f32.mxu1 %v167_v30 }
  0xff   :  { %315 = vmatmul.mubr.f32.gmra.mrb[2].mxu1 %v166_v31 }
 0x1ce   :  { %v310_v59 = vpop.f32.mrb[0].mxu1 }
 0x1cf   :  { %v311_v60 = vadd.f32 %v310_v59, %v237_v57  ;;  %v312_v61 = vpop.f32.mrb[1].mxu1 }
 0x1d0   :  { %v313_v62 = vadd.f32 %v312_v61, %v241_v58 }
 0x1d2   :  { %613 = vtanh.f32 %v313_v62  ;;  %v316_v63 = vpop.f32.mrb[2].mxu1 }
 0x1d3   :  { %615 = vtanh.f32 %v311_v60  ;;  %v317_v0 = vadd.f32 %v316_v63, %v237_v57  ;;  %v318_v1 = vpop.f32.mrb[3].mxu1 }
 0x1d4   :  { %v319_v2 = vadd.f32 %v318_v1, %v241_v58 }
 0x1d6   :  { %617 = vtanh.f32 %v319_v2 }
 0x1d7   :  { %619 = vtanh.f32 %v317_v0 }
 0x1dc   :  { %v614_v3 = vpop.eup %613 }
 0x1dd   :  { %v616_v4 = vpop.eup %615  ;;  %428 = vmatprep.mubr.f32.mxu0 %v614_v3 }
 0x1de   :  { %429 = vmatmul.mubr.f32.vlgmr.msra.gmra.mrb[4].mxu0 %v616_v4 }
 0x1e0   :  { %v618_v5 = vpop.eup %617 }
 0x1e1   :  { %v620_v6 = vpop.eup %619  ;;  %433 = vmatprep.mubr.f32.mxu0 %v618_v5 }
 0x1e2   :  { %434 = vmatmul.mubr.f32.gmra.mrb[6].mxu0 %v620_v6 }
 0x2b1   :  { %v496_v7 = vpop.f32.mrb[4].mxu0 }
 0x2b2   :  { %v497_v9 = vpop.f32.mrb[5].mxu0 }
 0x2b3   :  { %v498_v10 = vadd.f32 %v497_v9, %v496_v7 }
 0x2b5   :  { %v431_v11 = vadd.f32 %v498_v10, %v463_v8  ;;  %v499_v12 = vpop.f32.mrb[6].mxu0 }
 0x2b6   :  { %v500_v13 = vpop.f32.mrb[7].mxu0 }
 0x2b7   :  { %440 = vst.msk [vmem:[#allocation5] sm:$0xff] %vm439_vm6, %v431_v11  ;;  %v501_v14 = vadd.f32 %v500_v13, %v499_v12 }
 0x2b9   :  { %v436_v15 = vadd.f32 %v501_v14, %v463_v8 }
 0x2bb   :  { %441 = vst.msk [vmem:[#allocation5 + $0x8] sm:$0xff] %vm439_vm6, %v436_v15 }
 0x2bc   :  { %654 = shalt.err (!%p651_p12)
}
 0x2bd   :  { %s655_s30 = scalar_lea.hbm %s896_s7, 256 }
 0x2be   :  { %p656_p13 = scmp.ne.s32.totalorder %s896_s7, %s655_s30  ;;  %p659_p0 = scmp.lt.u32.totalorder %s655_s30, %s896_s7 }
 0x2c0   :  { %p661_p1 = pnand %p659_p0, %p656_p13 }
 0x2c2   :  { %664 = shalt.err (!%p661_p1)
}
 0x2c3   :  { %s674_s12 = smov 128   ;;  %s675_s1 = smov 8  }
 0x2c4   :  { %453 = dma.vmem_to_hbm [thread:$0]  %s448_s27, 256, %s896_s7, [#allocation4], %s674_s12, %s674_s12, %s675_s1  }
 0x2c5   :  { %667 = dma.done.wait [#allocation4], 256  }
 0x2c6   :  { %668 = vsyncadd [#allocation4], 4294967040 }
 0x2c7   :  { %457 = vsyncpa [#allocation3], 1 }
 0x2c8   :  { %458 = vsyncpa [#allocation4], 1 }

</bundles_post_ra>
